<compile_context>
chip_gen: v6e
topology: v6e:2x2x1
jax: 0.10.0
libtpu: 0.0.40
codegen_flags: <defaults>
</compile_context>

<pallas_src>
import math

import jax
import jax.numpy as jnp
from jax.experimental import pallas as pl
from jax.experimental.pallas import tpu as pltpu

# ---- dimensions fixed by the torch module ----
HIDDEN = 768                                 # BERT hidden size
TEXT_MID = 128                               # text_specific* width
CAT_IN = 6 * 10 + 48 * 10 + 2                # len(USEFUL_CATS)*10 + len(BIG_ISSUES)*10 + 2 = 542
CAT_OUT = 64
LING_IN, LING_OUT = 12, 10
ISSUE_IN, ISSUE_OUT = 10, 10
CLS_IN = CAT_OUT + LING_OUT + TEXT_MID + ISSUE_OUT    # 212
HID_DIM = 200
OUT = 2

# ---- kernel-side padding / synthetic sizes ----
VOCAB = 128                                  # synthetic vocab for the BertModel stand-in
SIDE_IN = CAT_IN + LING_IN + ISSUE_IN        # 564
K_IN = VOCAB + VOCAB + SIDE_IN               # 820 : [hist1 | hist2 | side]
K_PAD = 896                                  # 7 * 128 lanes
OUT_PAD = 128                                # lane-dense fused-weight / output columns


# --------------------------------------------------------------------------- kernel
def topic_kernel(x_ref, w_ref, b_ref, out_ref):
    # Entire forward (pooling + all nine Linears) folded offline into one fused
    # (K_PAD, OUT_PAD) bf16 weight: a single MXU push with f32 accumulation.
    out_ref[...] = (
        jnp.dot(x_ref[...], w_ref[...], preferred_element_type=jnp.float32)
        + b_ref[...]
    )


# --------------------------------------------------------------------------- wrapper
def _norm_hist(tokens):
    """Normalized token histogram: mean-over-tokens of embeddings == hist @ embedding."""
    oh = jax.nn.one_hot(tokens.reshape(-1), VOCAB, dtype=jnp.float32)    # (B*S, VOCAB)
    return jnp.sum(oh, axis=0) / float(tokens.size)                      # (VOCAB,)


@jax.jit
def topic_forward(cat_vec, ling_vec, tokens1, tokens2, issue_emb, folded):
    """Returns the (2,) prediction of TopicModel.forward for one example."""
    hist1 = _norm_hist(tokens1)                                           # (128,)
    hist2 = _norm_hist(tokens2)                                           # (128,)
    x = jnp.concatenate(
        [hist1, hist2, cat_vec, ling_vec, issue_emb,
         jnp.zeros((K_PAD - K_IN,), jnp.float32)])[None, :]               # (1, 896)
    x = x.astype(jnp.bfloat16)

    out = pl.pallas_call(
        topic_kernel,
        out_shape=jax.ShapeDtypeStruct((1, OUT_PAD), jnp.float32),
        in_specs=[pl.BlockSpec(memory_space=pltpu.MemorySpace.VMEM)] * 3,
        out_specs=pl.BlockSpec(memory_space=pltpu.MemorySpace.VMEM),
        cost_estimate=pl.CostEstimate(
            flops=2 * K_PAD * OUT_PAD,
            transcendentals=0,
            bytes_accessed=(K_PAD * OUT_PAD * 2      # bf16 fused weight
                            + K_PAD * 2              # bf16 input row
                            + OUT_PAD * 4 * 2),      # f32 bias + f32 output
        ),
    )(x, folded["w"], folded["b"])
    return out[0, :OUT]                                                   # (2,)


# --------------------------------------------------------------------------- params
def make_params(key):
    ks = jax.random.split(key, 10)

    def linear(k, fan_in, fan_out):
        bound = 1.0 / math.sqrt(fan_in)
        kw, kb = jax.random.split(k)
        w = jax.random.uniform(kw, (fan_in, fan_out), jnp.float32, -bound, bound)
        b = jax.random.uniform(kb, (fan_out,), jnp.float32, -bound, bound)
        return w, b

    w_cat, b_cat = linear(ks[0], CAT_IN, CAT_OUT)            # cat_specific
    w_ling, b_ling = linear(ks[1], LING_IN, LING_OUT)        # ling_specific
    w_issue, b_issue = linear(ks[2], ISSUE_IN, ISSUE_OUT)    # issue_specific
    w_t1, b_t1 = linear(ks[3], 2 * HIDDEN, TEXT_MID)         # text_specific1
    w_t2, b_t2 = linear(ks[4], TEXT_MID, TEXT_MID)           # text_specific2
    w_t3, b_t3 = linear(ks[5], TEXT_MID, TEXT_MID)           # text_specific3
    w_cls, b_cls = linear(ks[6], CLS_IN, HID_DIM)            # classification
    w_sll, b_sll = linear(ks[7], HID_DIM, HID_DIM)           # second_last_layer
    w_last, b_last = linear(ks[8], HID_DIM, OUT)             # last_layer
    embedding = 0.02 * jax.random.normal(ks[9], (VOCAB, HIDDEN), jnp.float32)

    return {
        "embedding": embedding,
        "w_cat": w_cat, "b_cat": b_cat,
        "w_ling": w_ling, "b_ling": b_ling,
        "w_issue": w_issue, "b_issue": b_issue,
        "w_text1": w_t1, "b_text1": b_t1,
        "w_text2": w_t2, "b_text2": b_t2,
        "w_text3": w_t3, "b_text3": b_t3,
        "w_cls": w_cls, "b_cls": b_cls,
        "w_sll": w_sll, "b_sll": b_sll,
        "w_last": w_last, "b_last": b_last,
    }


def fold_params(p):
    """Fold the fully-linear head (and the pooling/embedding) into one fused matmul."""
    # text chain: text_specific1 -> text_specific3 -> text_specific2
    Wt = p["w_text1"] @ p["w_text3"] @ p["w_text2"]                           # (1536, 128)
    bt = (p["b_text1"] @ p["w_text3"] + p["b_text3"]) @ p["w_text2"] + p["b_text2"]

    # classification -> second_last_layer -> last_layer
    Wh = p["w_cls"] @ p["w_sll"] @ p["w_last"]                                # (212, 2)
    bh = (p["b_cls"] @ p["w_sll"] + p["b_sll"]) @ p["w_last"] + p["b_last"]   # (2,)

    # split by the concat([cat_rep, ling_rep, text_rep, issue_rep]) layout
    o1 = CAT_OUT
    o2 = o1 + LING_OUT
    o3 = o2 + TEXT_MID
    Wh_cat, Wh_ling, Wh_text, Wh_issue = Wh[:o1], Wh[o1:o2], Wh[o2:o3], Wh[o3:]

    W_text = Wt @ Wh_text                                                     # (1536, 2)
    # Embedding fold: r = hist @ emb  =>  r @ W_text_half == hist @ (emb @ W_text_half)
    W_h1 = p["embedding"] @ W_text[:HIDDEN]                                   # (128, 2)
    W_h2 = p["embedding"] @ W_text[HIDDEN:]                                   # (128, 2)

    W_side = jnp.concatenate([p["w_cat"] @ Wh_cat,
                              p["w_ling"] @ Wh_ling,
                              p["w_issue"] @ Wh_issue], axis=0)               # (564, 2)
    b_all = (bh + p["b_cat"] @ Wh_cat + p["b_ling"] @ Wh_ling
             + p["b_issue"] @ Wh_issue + bt @ Wh_text)                        # (2,)

    # Single fused weight for the concatenated [hist1 | hist2 | side] input row.
    W_full = jnp.concatenate(
        [W_h1, W_h2, W_side, jnp.zeros((K_PAD - K_IN, OUT), jnp.float32)], axis=0)   # (896, 2)
    W_full = jnp.pad(W_full, ((0, 0), (0, OUT_PAD - OUT))).astype(jnp.bfloat16)      # (896, 128)
    bias = jnp.pad(b_all[None, :], ((0, 0), (0, OUT_PAD - OUT)))                     # (1, 128) f32

    return {"w": W_full, "b": bias}


# --------------------------------------------------------------------------- reference
def topic_forward_ref(cat_vec, ling_vec, tokens1, tokens2, issue_emb, params):
    """Pure-JAX reference mirroring the torch forward exactly (no folding)."""
    emb = params["embedding"]
    h1 = jnp.take(emb, tokens1, axis=0)                    # (B, S, 768)
    h2 = jnp.take(emb, tokens2, axis=0)
    r1 = jnp.mean(jnp.mean(h1, axis=1), axis=0)            # (768,)
    r2 = jnp.mean(jnp.mean(h2, axis=1), axis=0)

    text = jnp.concatenate([r1, r2]) @ params["w_text1"] + params["b_text1"]
    text = text @ params["w_text3"] + params["b_text3"]
    text = text @ params["w_text2"] + params["b_text2"]

    cat_rep = cat_vec @ params["w_cat"] + params["b_cat"]
    ling_rep = ling_vec @ params["w_ling"] + params["b_ling"]
    issue_rep = issue_emb @ params["w_issue"] + params["b_issue"]

    cls = jnp.concatenate([cat_rep, ling_rep, text, issue_rep])
    cls = cls @ params["w_cls"] + params["b_cls"]
    cls = cls @ params["w_sll"] + params["b_sll"]
    return cls @ params["w_last"] + params["b_last"]


# --------------------------------------------------------------------------- main
if __name__ == "__main__":
    key = jax.random.PRNGKey(0)
    kp, k1, k2, k3, k4, k5 = jax.random.split(key, 6)

    B, S = 2, 8
    params = make_params(kp)
    folded = fold_params(params)

    tokens1 = jax.random.randint(k1, (B, S), 0, VOCAB, dtype=jnp.int32)
    tokens2 = jax.random.randint(k2, (B, S), 0, VOCAB, dtype=jnp.int32)
    cat_vec = 0.1 * jax.random.normal(k3, (CAT_IN,), jnp.float32)
    ling_vec = 0.1 * jax.random.normal(k4, (LING_IN,), jnp.float32)
    issue_emb = 0.1 * jax.random.normal(k5, (ISSUE_IN,), jnp.float32)

    pred = jax.block_until_ready(
        topic_forward(cat_vec, ling_vec, tokens1, tokens2, issue_emb, folded))
    ref = topic_forward_ref(cat_vec, ling_vec, tokens1, tokens2, issue_emb, params)

    assert pred.shape == (OUT,)
    # Tolerance covers both the folding rounding-order change and bf16 fused weights.
    assert jnp.allclose(pred, ref, atol=2e-3, rtol=2e-3), (pred, ref)
    print("KERNEL_OK")
</pallas_src>

<mosaic_0001>
module attributes {stable_mosaic.version = 11 : i64} {
  func.func @topic_kernel(%arg0: memref<1x896xbf16, #tpu.memory_space<vmem>>, %arg1: memref<896x128xbf16, #tpu.memory_space<vmem>>, %arg2: memref<1x128xf32, #tpu.memory_space<vmem>>, %arg3: memref<1x128xf32, #tpu.memory_space<vmem>>) attributes {dimension_semantics = [], scalar_prefetch = 0 : i64, scratch_operands = 0 : i64, tpu.core_type = #tpu.core_type<tc>} {
    %c0 = arith.constant 0 : index
    %c0_0 = arith.constant 0 : index
    %0 = vector.load %arg0[%c0, %c0_0] : memref<1x896xbf16, #tpu.memory_space<vmem>>, vector<1x896xbf16>
    %c0_1 = arith.constant 0 : index
    %c0_2 = arith.constant 0 : index
    %1 = vector.load %arg1[%c0_1, %c0_2] : memref<896x128xbf16, #tpu.memory_space<vmem>>, vector<896x128xbf16>
    %cst = arith.constant dense<0.000000e+00> : vector<1x128xf32>
    %2 = tpu.matmul %0, %1, %cst {dimension_numbers = #tpu.dot_dimension_numbers<[1], [0], [0], [1], [0, 0, 1, 1], [], []>} : vector<1x896xbf16>, vector<896x128xbf16>, vector<1x128xf32> -> vector<1x128xf32>
    %c0_3 = arith.constant 0 : index
    %c0_4 = arith.constant 0 : index
    %3 = vector.load %arg2[%c0_3, %c0_4] : memref<1x128xf32, #tpu.memory_space<vmem>>, vector<1x128xf32>
    %4 = arith.addf %2, %3 : vector<1x128xf32>
    %c0_5 = arith.constant 0 : index
    %c0_6 = arith.constant 0 : index
    %5 = vector.load %arg3[%c0_5, %c0_6] : memref<1x128xf32, #tpu.memory_space<vmem>>, vector<1x128xf32>
    tpu.vector_store %arg3[%c0_5, %c0_6], %4 {strides = array<i32>} : memref<1x128xf32, #tpu.memory_space<vmem>>, vector<1x128xf32>,
    return
  }
}

</mosaic_0001>

<bundles_post_ra>
// kernel: eq.1
= control target key start
LH: loop header
LB: loop body
LE: loop exit
PB: predicated region body
PF: predicated region fallthrough
CT: control target
= control target key end

     0   :  { %vm8_vm0 = vcmask 64512   ;;  %vm14_vm1 = vcmask 130112   ;;  %s42_s0 = inlined_call_operand.vmem [shape: s32[2,8], index: 0, kind: input, shape index: {}]   ;;  %s43_s1 = inlined_call_operand.vmem [shape: s32[16], index: 1, kind: output, shape index: {}]  }
   0x1   :  { %v5_v0 = vld [vmem:[%s42_s0] sm:$0x3]  ;;  %s25_s0 = smov 8  }
   0x2   :  { %6 = vst [vmem:[#allocation1] sm:$0x3] %v5_v0 }
   0x9   :  { %v11_v1 = vld [vmem:[#allocation1 + $0x1] sm:$0x1]   ;;  %v7_v2 = vld [vmem:[#allocation1] sm:$0x1]  }
   0xa   :  { %12 = vrot.lane.b32.xlu0 %v11_v1, %s25_s0  ;;  %9 = vst.msk [vmem:[#allocation0] sm:$0x1] %vm8_vm0, %v7_v2  }
  0x7c   :  { %v13_v3 = vpop.permute.xlu0 %12  }
  0x7d   :  { %15 = vst.msk [vmem:[#allocation0] sm:$0x1] %vm14_vm1, %v13_v3  }
  0x84   :  { %v20_v4 = vld [vmem:[#allocation0] sm:$0x1] }
  0x85   :  { %23 = vst [vmem:[%s43_s1] sm:$0x1] %v20_v4 }

// kernel: topic_forward.1
= control target key start
LH: loop header
LB: loop body
LE: loop exit
PB: predicated region body
PF: predicated region fallthrough
CT: control target
= control target key end

     0   :  { %8 = vsyncpa [#allocation3], 0  ;;  %s937_s12 = smov [#allocation2]   ;;  %s992_s0 = inlined_call_operand.vmem [shape: bf16[1,896], index: 0, kind: input, shape index: {}]   ;;  %s993_s1 = inlined_call_operand.hbm [shape: bf16[896,128], index: 1, kind: input, shape index: {}]   ;;  %s994_s2 = inlined_call_operand.vmem [shape: f32[1,128], index: 2, kind: input, shape index: {}]   ;;  %s995_s3 = inlined_call_operand.vmem [shape: f32[1,128], index: 3, kind: output, shape index: {}]  }
   0x1   :  { %s16_s13 = sshll.u32 %s937_s12, 4  ;;  %s17_s13 = int_to_ptr.vmem [resolvable:$true] %s16_s13 }
   0x2   :  { %s923_s14 = scalar_lea.vmem %s17_s13, 7168  ;;  %p928_p1 = scmp.lt.s32.totalorder %s17_s13, %s17_s13 }
   0x3   :  { %p924_p0 = scmp.ne.s32.totalorder %s17_s13, %s923_s14  ;;  %p929_p2 = scmp.lt.s32.totalorder %s923_s14, %s923_s14 }
   0x5   :  { %p930_p3 = por %p929_p2, %p928_p1 }
   0x7   :  { %p931_p4 = pnand %p930_p3, %p924_p0 }
   0x9   :  { %934 = shalt.err (!%p931_p4)
}
   0xa   :  { %s938_s15 = smov 64   ;;  %s939_s16 = smov 4  }
   0xb   :  { %22 = dma.hbm_to_vmem [thread:$0]  %s993_s1, 7168, %s17_s13, [#allocation3], %s938_s15, %s938_s15, %s939_s16  }
   0xc   :  { %935 = dma.done.wait [#allocation3], 7168  }
   0xd   :  { %936 = vsyncadd [#allocation3], 4294960128  ;;  %v858_v0 = vld [vmem:[#allocation2 + $0x78] sm:$0xff]   ;;  %v862_v4 = vld [vmem:[#allocation2 + $0x70] sm:$0xff]   ;;  %v940_v22 = vmov 1966171168   ;;  %v148_v24 = vlaneseq }
   0xe   :  { %v859_v1 = vld [vmem:[#allocation2 + $0xf8] sm:$0xff]   ;;  %757 = vmatprep.subr.bf16.mxu0 %v858_v0  ;;  %v863_v5 = vld [vmem:[#allocation2 + $0xf0] sm:$0xff]   ;;  %v866_v8 = vld [vmem:[#allocation2 + $0x68] sm:$0xff]   ;;  %v146_v23 = vunpack.c.l.s4 %v940_v22  ;;  %v941_v42 = vmov 0.0   ;;  %vm942_vm0 = vmmov 0  }
   0xf   :  { %v860_v2 = vld [vmem:[#allocation2 + $0x38] sm:$0xff]   ;;  %779 = vmatprep.subr.bf16.mxu1 %v859_v1  ;;  %v864_v6 = vld [vmem:[#allocation2 + $0x30] sm:$0xff]   ;;  %v867_v9 = vld [vmem:[#allocation2 + $0xe8] sm:$0xff]   ;;  %v149_v30 = vshrl.u32 %v148_v24, 7 }
  0x10   :  { %v861_v3 = vld [vmem:[#allocation2 + $0xb8] sm:$0xff]   ;;  %758 = vmatpush3.bf16.msra.mxu0 %v860_v2  ;;  %v865_v7 = vld [vmem:[#allocation2 + $0xb0] sm:$0xff]   ;;  %v868_v10 = vld [vmem:[#allocation2 + $0x28] sm:$0xff]   ;;  %v147_v29 = vunpack.c.0.s8 %v146_v23 }
  0x11   :  { %780 = vmatpush3.bf16.msra.mxu1 %v861_v3  ;;  %759 = vmatprep.subr.bf16.mxu0 %v862_v4  ;;  %v869_v11 = vld [vmem:[#allocation2 + $0xa8] sm:$0xff]   ;;  %v870_v12 = vld [vmem:[#allocation2 + $0x60] sm:$0xff]   ;;  %v874_v16 = vld [vmem:[#allocation2 + $0x58] sm:$0xff]  }
  0x12   :  { %781 = vmatprep.subr.bf16.mxu1 %v863_v5  ;;  %v871_v13 = vld [vmem:[#allocation2 + $0xe0] sm:$0xff]   ;;  %v875_v17 = vld [vmem:[#allocation2 + $0xd8] sm:$0xff]   ;;  %v878_v20 = vld [vmem:[#allocation2 + $0x50] sm:$0xff]   ;;  %v966_v35 = vsub.s32 %v147_v29, %v149_v30 }
  0x13   :  { %v872_v14 = vld [vmem:[#allocation2 + $0x20] sm:$0xff]   ;;  %v876_v18 = vld [vmem:[#allocation2 + $0x18] sm:$0xff]   ;;  %v879_v21 = vld [vmem:[#allocation2 + $0xd0] sm:$0xff]  }
  0x14   :  { %760 = vmatpush3.bf16.msra.mxu0 %v864_v6  ;;  %v873_v15 = vld [vmem:[#allocation2 + $0xa0] sm:$0xff]   ;;  %v877_v19 = vld [vmem:[#allocation2 + $0x98] sm:$0xff]   ;;  %v880_v25 = vld [vmem:[#allocation2 + $0x10] sm:$0xff]  }
  0x15   :  { %782 = vmatpush3.bf16.msra.mxu1 %v865_v7  ;;  %761 = vmatprep.subr.bf16.mxu0 %v866_v8  ;;  %v881_v26 = vld [vmem:[#allocation2 + $0x90] sm:$0xff]   ;;  %v882_v27 = vld [vmem:[#allocation2 + $0x48] sm:$0xff]   ;;  %v886_v33 = vld [vmem:[#allocation2 + $0x40] sm:$0xff]  }
  0x16   :  { %783 = vmatprep.subr.bf16.mxu1 %v867_v9  ;;  %v883_v28 = vld [vmem:[#allocation2 + $0xc8] sm:$0xff]   ;;  %v887_v34 = vld [vmem:[#allocation2 + $0xc0] sm:$0xff]   ;;  %v891_v41 = vld [vmem:[#allocation2 + $0x178] sm:$0xff]  }
  0x17   :  { %v884_v31 = vld [vmem:[#allocation2 + $0x8] sm:$0xff]   ;;  %v888_v36 = vld [vmem:[#allocation2] sm:$0xff]   ;;  %v892_v47 = vld [vmem:[#allocation2 + $0x138] sm:$0xff]  }
  0x18   :  { %762 = vmatpush3.bf16.msra.mxu0 %v868_v10  ;;  %v885_v32 = vld [vmem:[#allocation2 + $0x88] sm:$0xff]   ;;  %v889_v37 = vld [vmem:[#allocation2 + $0x80] sm:$0xff]   ;;  %v894_v50 = vld [vmem:[#allocation2 + $0x170] sm:$0xff]  }
  0x19   :  { %784 = vmatpush3.bf16.msra.mxu1 %v869_v11  ;;  %763 = vmatprep.subr.bf16.mxu0 %v870_v12  ;;  %v29_v38 = vld [vmem:[%s992_s0] sm:$0x7f]  ;;  %v893_v52 = vld [vmem:[#allocation2 + $0x1b8] sm:$0xff]   ;;  %v895_v54 = vld [vmem:[#allocation2 + $0x130] sm:$0xff]  }
  0x1a   :  { %785 = vmatprep.subr.bf16.mxu1 %v871_v13  ;;  %v144_v39 = vcombine.high %v29_v38, %v29_v38  ;;  %v151_v40 = vrot.slane %v29_v38, %v966_v35  ;;  %v897_v55 = vld [vmem:[#allocation2 + $0x168] sm:$0xff]   ;;  %v896_v56 = vld [vmem:[#allocation2 + $0x1b0] sm:$0xff]   ;;  %v900_v58 = vld [vmem:[#allocation2 + $0x160] sm:$0xff]  }
  0x1b   :  { %v898_v57 = vld [vmem:[#allocation2 + $0x128] sm:$0xff]   ;;  %v901_v60 = vld [vmem:[#allocation2 + $0x120] sm:$0xff]   ;;  %v903_v61 = vld [vmem:[#allocation2 + $0x158] sm:$0xff]  }
  0x1c   :  { %764 = vmatpush3.bf16.msra.mxu0 %v872_v14  ;;  %v159_v43 = vcombine.high %v151_v40, %v151_v40  ;;  %v167_v44 = vrot.slane %v151_v40, %v966_v35  ;;  %v158_v45 = vrot.slane %v144_v39, %v966_v35  ;;  %v899_v59 = vld [vmem:[#allocation2 + $0x1a8] sm:$0xff]   ;;  %v902_v62 = vld [vmem:[#allocation2 + $0x1a0] sm:$0xff]   ;;  %v904_v63 = vld [vmem:[#allocation2 + $0x118] sm:$0xff]  }
  0x1d   :  { %786 = vmatpush3.bf16.msra.mxu1 %v873_v15  ;;  %765 = vmatprep.subr.bf16.mxu0 %v874_v16  ;;  %v906_v0 = vld [vmem:[#allocation2 + $0x150] sm:$0xff]   ;;  %v905_v1 = vld [vmem:[#allocation2 + $0x198] sm:$0xff]   ;;  %v909_v3 = vld [vmem:[#allocation2 + $0x148] sm:$0xff]  }
  0x1e   :  { %787 = vmatprep.subr.bf16.mxu1 %v875_v17  ;;  %v181_v46 = vrot.slane %v159_v43, %v966_v35  ;;  %v160_v48 = vcombine.high %v158_v45, %v158_v45  ;;  %v189_v49 = vcombine.high %v167_v44, %v167_v44  ;;  %v907_v2 = vld [vmem:[#allocation2 + $0x110] sm:$0xff]   ;;  %v910_v5 = vld [vmem:[#allocation2 + $0x108] sm:$0xff]   ;;  %v912_v6 = vld [vmem:[#allocation2 + $0x140] sm:$0xff]   ;;  %v174_v9 = vrot.slane %v158_v45, %v966_v35 }
  0x1f   :  { %v908_v4 = vld [vmem:[#allocation2 + $0x190] sm:$0xff]   ;;  %v911_v7 = vld [vmem:[#allocation2 + $0x188] sm:$0xff]   ;;  %v913_v8 = vld [vmem:[#allocation2 + $0x100] sm:$0xff]  }
  0x20   :  { %766 = vmatpush3.bf16.msra.mxu0 %v876_v18  ;;  %567 = vmatprep.mubr.bf16.mxu0 %v181_v46  ;;  %v191_v51 = vcombine.high %v181_v46, %v181_v46  ;;  %v188_v53 = vrot.slane %v160_v48, %v966_v35  ;;  %v914_v10 = vld [vmem:[#allocation2 + $0x180] sm:$0xff]   ;;  %v190_v11 = vcombine.high %v174_v9, %v174_v9 }
  0x21   :  { %788 = vmatpush3.bf16.msra.mxu1 %v877_v19  ;;  %767 = vmatprep.subr.bf16.mxu0 %v878_v20 }
  0x22   :  { %789 = vmatprep.subr.bf16.mxu1 %v879_v21  ;;  %607 = vmatprep.mubr.bf16.mxu1 %v191_v51  ;;  %v142_v21 = vld [vmem:[%s994_s2] sm:$0x1] }
  0x24   :  { %768 = vmatpush3.bf16.msra.mxu0 %v880_v25 }
  0x25   :  { %790 = vmatpush3.bf16.msra.mxu1 %v881_v26  ;;  %769 = vmatprep.subr.bf16.mxu0 %v882_v27 }
  0x26   :  { %791 = vmatprep.subr.bf16.mxu1 %v883_v28 }
  0x28   :  { %770 = vmatpush3.bf16.msra.mxu0 %v884_v31 }
  0x29   :  { %792 = vmatpush3.bf16.msra.mxu1 %v885_v32  ;;  %771 = vmatprep.subr.bf16.mxu0 %v886_v33 }
  0x2a   :  { %793 = vmatprep.subr.bf16.mxu1 %v887_v34 }
  0x2c   :  { %772 = vmatpush3.bf16.msra.mxu0 %v888_v36 }
  0x2d   :  { %794 = vmatpush3.bf16.msra.mxu1 %v889_v37  ;;  %801 = vmatprep.subr.bf16.mxu0 %v891_v41 }
  0x2e   :  { %832 = vmatprep.subr.bf16.mxu1 %v941_v42 }
  0x2f   :  { %568 = vmatmul.mubr.bf16.vlgmr.msra.gmra.mxu0 %v167_v44 }
  0x30   :  { %802 = vmatpush3.bf16.msra.mxu0 %v892_v47  ;;  %608 = vmatmul.mubr.bf16.vlgmr.msra.gmra.mxu1 %v189_v49 }
  0x31   :  { %803 = vmatprep.subr.bf16.mxu0 %v894_v50  ;;  %833 = vmatpush3.bf16.msra.mxu1 %v893_v52 }
  0x32   :  { %647 = vmatprep.mubr.bf16.mxu0 %v188_v53  ;;  %834 = vmatprep.subr.bf16.mxu1 %v941_v42 }
  0x33   :  { %848 = vmatprep.mubr.msk.bf16.mxu1 %vm942_vm0, %v941_v42 }
  0x34   :  { %804 = vmatpush3.bf16.msra.mxu0 %v895_v54 }
  0x35   :  { %805 = vmatprep.subr.bf16.mxu0 %v897_v55  ;;  %835 = vmatpush3.bf16.msra.mxu1 %v896_v56 }
  0x36   :  { %836 = vmatprep.subr.bf16.mxu1 %v941_v42 }
  0x38   :  { %806 = vmatpush3.bf16.msra.mxu0 %v898_v57 }
  0x39   :  { %807 = vmatprep.subr.bf16.mxu0 %v900_v58  ;;  %837 = vmatpush3.bf16.msra.mxu1 %v899_v59 }
  0x3a   :  { %838 = vmatprep.subr.bf16.mxu1 %v941_v42 }
  0x3c   :  { %808 = vmatpush3.bf16.msra.mxu0 %v901_v60 }
  0x3d   :  { %809 = vmatprep.subr.bf16.mxu0 %v903_v61  ;;  %839 = vmatpush3.bf16.msra.mxu1 %v902_v62 }
  0x3e   :  { %840 = vmatprep.subr.bf16.mxu1 %v941_v42 }
  0x40   :  { %810 = vmatpush3.bf16.msra.mxu0 %v904_v63 }
  0x41   :  { %811 = vmatprep.subr.bf16.mxu0 %v906_v0  ;;  %841 = vmatpush3.bf16.msra.mxu1 %v905_v1 }
  0x42   :  { %842 = vmatprep.subr.bf16.mxu1 %v941_v42 }
  0x44   :  { %812 = vmatpush3.bf16.msra.mxu0 %v907_v2 }
  0x45   :  { %813 = vmatprep.subr.bf16.mxu0 %v909_v3  ;;  %843 = vmatpush3.bf16.msra.mxu1 %v908_v4 }
  0x46   :  { %844 = vmatprep.subr.bf16.mxu1 %v941_v42 }
  0x48   :  { %814 = vmatpush3.bf16.msra.mxu0 %v910_v5 }
  0x49   :  { %815 = vmatprep.subr.bf16.mxu0 %v912_v6  ;;  %845 = vmatpush3.bf16.msra.mxu1 %v911_v7 }
  0x4a   :  { %846 = vmatprep.subr.bf16.mxu1 %v941_v42 }
  0x4c   :  { %816 = vmatpush3.bf16.msra.mxu0 %v913_v8 }
  0x4d   :  { %847 = vmatpush3.bf16.msra.mxu1 %v914_v10 }
  0x4f   :  { %648 = vmatmul.mubr.bf16.vlgmr.msra.gmra.mxu0 %v174_v9 }
  0x50   :  { %849 = vmatmul.mubr.bf16.vlgmr.msra.gmra.mxu1 %v190_v11 }
  0xef   :  { %v773_v12 = vpop.f32.mrf.mxu0 }
  0xf0   :  { %v795_v13 = vpop.f32.mrf.mxu1 }
  0xf1   :  { %v774_v14 = vpop.f32.mrf.mxu0 }
  0xf2   :  { %v796_v15 = vpop.f32.mrf.mxu1  ;;  %v775_v20 = vadd.f32 %v774_v14, %v773_v12 }
  0xf3   :  { %v776_v16 = vpop.f32.mrf.mxu0  ;;  %v797_v23 = vadd.f32 %v796_v15, %v795_v13 }
  0xf4   :  { %v798_v17 = vpop.f32.mrf.mxu1  ;;  %v570_v22 = vadd.f32 %v775_v20, %v142_v21 }
  0xf5   :  { %v777_v18 = vpop.f32.mrf.mxu0 }
  0xf6   :  { %v799_v19 = vpop.f32.mrf.mxu1  ;;  %v610_v27 = vadd.f32 %v797_v23, %v570_v22 }
 0x10f   :  { %v817_v24 = vpop.f32.mrf.mxu0 }
 0x110   :  { %v689_v25 = vpop.f32.mrf.mxu1 }
 0x111   :  { %v818_v26 = vpop.f32.mrf.mxu0 }
 0x112   :  { %v819_v28 = vadd.f32 %v818_v26, %v817_v24  ;;  %v850_v29 = vpop.f32.mrf.mxu1 }
 0x113   :  { %v820_v30 = vpop.f32.mrf.mxu0 }
 0x114   :  { %v650_v31 = vadd.f32 %v819_v28, %v610_v27  ;;  %v692_v32 = vpop.f32.mrf.mxu1 }
 0x115   :  { %v821_v33 = vpop.f32.mrf.mxu0 }
 0x116   :  { %v690_v34 = vadd.f32 %v689_v25, %v650_v31  ;;  %v851_v35 = vpop.f32.mrf.mxu1 }
 0x118   :  { %695 = vst [vmem:[%s995_s3] sm:$0x1] %v690_v34 }
 0x119   :  { %700 = vsyncpa [#allocation3], 1 }

</bundles_post_ra>
